<compile_context>
chip_gen: v7x
topology: tpu7x:2x2x1
jax: 0.10.0
libtpu: 0.0.40
codegen_flags: <defaults>
</compile_context>

<pallas_src>
import functools

import jax
import jax.numpy as jnp
from jax import lax
from jax.experimental import pallas as pl
from jax.experimental.pallas import tpu as pltpu


LIF_DECAY = 0.9     # membrane decay of the LIF layer
THRESHOLD = 0.5     # spike threshold
RO_DECAY = 0.8      # readout leaky-integrator decay

_SUBLANE = 8
_LANE = 128
_UNROLL_CAP = 64    # max statically-unrolled timesteps per grid step


def _round_up(x, m):
    return (x + m - 1) // m * m


def _cdiv(a, b):
    return -(-a // b)


@functools.lru_cache(maxsize=1)
def _vmem_budget_bytes():
    """Per-generation VMEM budget (leaves headroom for compiler scratch)."""
    try:
        cap = int(pltpu.get_tpu_info().vmem_capacity_bytes)
    except Exception:
        cap = 64 * 1024 * 1024          # conservative fallback (v7x-sized)
    return int(cap * 3 // 4)            # ~48 MiB on v7x, ~96 MiB on v5e/v6e


def _choose_time_blocks(T, B_blk, E, H_pad, O_pad, budget):
    """Largest time chunk that fits the VMEM budget (whole T if possible)."""
    # Double-buffered resident weights (W_in/W_rec bf16, W_ro/b_ro f32).
    w_bytes = 2 * (E * H_pad * 2 + H_pad * H_pad * 2
                   + H_pad * O_pad * 4 + O_pad * 4)
    fixed = (w_bytes
             + 3 * B_blk * H_pad * 4      # v/s/r state scratch
             + 2 * B_blk * O_pad * 4      # output block (double-buffered)
             + (2 << 20))                 # slack for internal scratch
    avail = max(budget - fixed, 1 << 20)
    per_step = 2 * B_blk * E * 2          # double-buffered bf16 x rows / step
    t_max = max(1, avail // per_step)
    t_max = int(min(t_max, T, _UNROLL_CAP))
    n_t = _cdiv(T, t_max)
    t_chunk = _cdiv(T, n_t)               # balanced chunks (no tiny tail)
    T_pad = n_t * t_chunk
    return t_chunk, n_t, T_pad


def _make_kernel(t_total, t_chunk, b_blk, n_classes, has_tail):
    # Closed-form geometric sum of the per-step bias accumulation:
    #   m_T = sum_t ro^(T-t) (s_t @ W_ro + b) = r_T @ W_ro + b * sum_k ro^k
    geom = (1.0 - RO_DECAY ** t_total) / (1.0 - RO_DECAY)
    inv_t = 1.0 / float(t_total)

    def kernel(x_ref, w_in_ref, w_rec_ref, w_ro_ref, b_ro_ref, out_ref,
               v_scr, s_scr, r_scr):
        """One (batch-block, time-chunk) step; finalize on the last chunk.

        x_ref    : [t_chunk*B_blk, E]   bf16, time-major chunk of embeddings
        w_in_ref : [E, H_pad]           bf16 input projection
        w_rec_ref: [H_pad, H_pad]       bf16 recurrent projection
        w_ro_ref : [H_pad, O_pad]       f32 readout projection
        b_ro_ref : [1, O_pad]           f32 readout bias
        out_ref  : [B_blk, O_pad]       f32 softmax probabilities
        scratch  : v/s/r [B_blk, H_pad] f32 persistent state (per batch block)
        """
        t_blk = pl.program_id(1)
        n_t = pl.num_programs(1)

        @pl.when(t_blk == 0)
        def _init():
            v_scr[...] = jnp.zeros_like(v_scr)
            s_scr[...] = jnp.zeros_like(s_scr)
            r_scr[...] = jnp.zeros_like(r_scr)

        # Non-recurrent input projection for the whole chunk: one MXU matmul
        # with t_chunk*B_blk rows (bf16 x bf16 -> f32 accumulate).
        cur_all = jnp.dot(x_ref[...], w_in_ref[...],
                          preferred_element_type=jnp.float32)

        v = v_scr[...]
        s = s_scr[...]
        r = r_scr[...]
        w_rec = w_rec_ref[...]          # bf16, resident

        base_step = t_blk * t_chunk     # global timestep of this chunk's start

        # Static unroll: lets the scheduler overlap step i+1's recurrent
        # matmul with step i's VPU reset/threshold work.
        for i in range(t_chunk):
            # bf16 recurrent matmul on the critical path (s is exactly {0,1}).
            cur = cur_all[i * b_blk:(i + 1) * b_blk, :] + jnp.dot(
                s.astype(jnp.bfloat16), w_rec,
                preferred_element_type=jnp.float32)
            v_new = jnp.float32(LIF_DECAY) * v * (1.0 - s) + cur   # reset
            s_new = (v_new > jnp.float32(THRESHOLD)).astype(jnp.float32)
            r_new = jnp.float32(RO_DECAY) * r + s_new              # decayed sum
            if has_tail:
                valid = (base_step + i) < t_total
                v = jnp.where(valid, v_new, v)
                s = jnp.where(valid, s_new, s)
                r = jnp.where(valid, r_new, r)
            else:
                v, s, r = v_new, s_new, r_new

        v_scr[...] = v
        s_scr[...] = s
        r_scr[...] = r

        @pl.when(t_blk == n_t - 1)
        def _finalize():
            # Readout matmul (hoisted out of the time loop) + closed-form bias.
            m = jnp.dot(r, w_ro_ref[...], preferred_element_type=jnp.float32)
            m = m + jnp.float32(geom) * b_ro_ref[...]
            logits = m * jnp.float32(inv_t)
            # Mask padded class lanes before the softmax.
            lane = lax.broadcasted_iota(jnp.int32, logits.shape, 1)
            logits = jnp.where(lane < n_classes, logits, jnp.float32(-1e30))
            logits = logits - jnp.max(logits, axis=-1, keepdims=True)
            e = jnp.exp(logits)
            # Exact divide (runs once; negligible cost, matches torch softmax).
            out_ref[...] = e / jnp.sum(e, axis=-1, keepdims=True)

    return kernel


def spasnn_forward(feed_data, emb_weight, w_in, w_rec, w_ro, b_ro):
    """SPASNN.forward: token ids [B, T] -> class probabilities [B, O]."""
    return _spasnn_forward(feed_data, emb_weight, w_in, w_rec, w_ro, b_ro,
                           _vmem_budget_bytes())


@functools.partial(jax.jit, static_argnums=6)
def _spasnn_forward(feed_data, emb_weight, w_in, w_rec, w_ro, b_ro,
                    vmem_budget):
    B, T = feed_data.shape
    E = emb_weight.shape[1]
    H = w_in.shape[1]
    O = w_ro.shape[1]

    B_pad = _round_up(B, _SUBLANE)
    H_pad = _round_up(H, _LANE)
    O_pad = _round_up(O, _LANE)

    # Optional batch split so v7x's second TensorCore gets independent work
    # (only when each half still feeds the MXU with plenty of rows).
    n_bblk = 2 if (B_pad >= 256 and B_pad % 32 == 0) else 1
    B_blk = B_pad // n_bblk

    t_chunk, n_t, T_pad = _choose_time_blocks(T, B_blk, E, H_pad, O_pad,
                                              vmem_budget)
    has_tail = (T_pad != T)

    # Embedding gather directly in time-major layout, in bf16 (halves the
    # bytes of the materialized activation).  Dropout is identity at eval.
    emb_bf16 = emb_weight.astype(jnp.bfloat16)
    x = jnp.take(emb_bf16, feed_data.T, axis=0)                   # [T, B, E]
    x = jnp.pad(x, ((0, T_pad - T), (0, B_pad - B), (0, 0)))      # [T_pad,B_pad,E]
    # [n_bblk, T_pad*B_blk, E]: each batch block is a contiguous time-major slab.
    x = x.reshape(T_pad, n_bblk, B_blk, E)
    x = jnp.transpose(x, (1, 0, 2, 3)).reshape(n_bblk, T_pad * B_blk, E)

    w_in_p = jnp.pad(w_in, ((0, 0), (0, H_pad - H))).astype(jnp.bfloat16)
    w_rec_p = jnp.pad(w_rec, ((0, H_pad - H), (0, H_pad - H))).astype(jnp.bfloat16)
    w_ro_p = jnp.pad(w_ro, ((0, H_pad - H), (0, O_pad - O))).astype(jnp.float32)
    b_ro_p = jnp.pad(b_ro.reshape(1, O), ((0, 0), (0, O_pad - O))).astype(jnp.float32)

    kernel = _make_kernel(T, t_chunk, B_blk, O, has_tail)
    rows = t_chunk * B_blk

    out = pl.pallas_call(
        kernel,
        out_shape=jax.ShapeDtypeStruct((B_pad, O_pad), jnp.float32),
        grid=(n_bblk, n_t),
        in_specs=[
            # x: streamed time chunks, per batch block (leading dim squeezed).
            pl.BlockSpec((None, rows, E), lambda b, t: (b, t, 0)),
            pl.BlockSpec((E, H_pad), lambda b, t: (0, 0)),        # W_in (resident)
            pl.BlockSpec((H_pad, H_pad), lambda b, t: (0, 0)),    # W_rec (resident)
            pl.BlockSpec((H_pad, O_pad), lambda b, t: (0, 0)),    # W_ro (resident)
            pl.BlockSpec((1, O_pad), lambda b, t: (0, 0)),        # b_ro (resident)
        ],
        out_specs=pl.BlockSpec((B_blk, O_pad), lambda b, t: (b, 0)),
        scratch_shapes=[
            pltpu.VMEM((B_blk, H_pad), jnp.float32),   # membrane potential v
            pltpu.VMEM((B_blk, H_pad), jnp.float32),   # spikes s
            pltpu.VMEM((B_blk, H_pad), jnp.float32),   # decayed spike sum r
        ],
        compiler_params=pltpu.CompilerParams(
            dimension_semantics=("parallel", "arbitrary"),  # batch ∥, time serial
            vmem_limit_bytes=vmem_budget,
        ),
    )(x, w_in_p, w_rec_p, w_ro_p, b_ro_p)

    return out[:B, :O]


def make_params(key, vocab_size, emb_dim, hid_dim, out_dim):
    k0, k1, k2, k3, k4 = jax.random.split(key, 5)
    emb_weight = jax.random.normal(k0, (vocab_size, emb_dim), jnp.float32) * 0.1
    w_in = jax.random.normal(k1, (emb_dim, hid_dim), jnp.float32) * (1.0 / emb_dim ** 0.5)
    w_rec = jax.random.normal(k2, (hid_dim, hid_dim), jnp.float32) * (1.0 / hid_dim ** 0.5)
    w_ro = jax.random.normal(k3, (hid_dim, out_dim), jnp.float32) * (1.0 / hid_dim ** 0.5)
    b_ro = jax.random.normal(k4, (1, out_dim), jnp.float32) * 0.01
    return emb_weight, w_in, w_rec, w_ro, b_ro


if __name__ == "__main__":
    # Small shapes consistent with the module: batch=2, seq=8, emb=32, hid=32, out=4
    B, T = 2, 8
    VOCAB, EMB, HID, OUT = 50, 32, 32, 4

    key = jax.random.PRNGKey(0)
    k_tok, k_par = jax.random.split(key)

    feed_data = jax.random.randint(k_tok, (B, T), 0, VOCAB, dtype=jnp.int32)
    emb_weight, w_in, w_rec, w_ro, b_ro = make_params(k_par, VOCAB, EMB, HID, OUT)

    out = spasnn_forward(feed_data, emb_weight, w_in, w_rec, w_ro, b_ro)
    out = jax.block_until_ready(out)

    assert out.shape == (B, OUT)
    assert bool(jnp.all(jnp.isfinite(out)))
    # softmax rows sum to ~1 (exact divide in finalize)
    assert bool(jnp.allclose(jnp.sum(out, axis=-1), 1.0, atol=1e-4))

    print("KERNEL_OK")
</pallas_src>

<mosaic_0001>
module attributes {stable_mosaic.version = 11 : i64} {
  func.func @kernel(%arg0: i32, %arg1: i32, %arg2: memref<1x64x32xbf16, #tpu.memory_space<vmem>>, %arg3: memref<32x128xbf16, #tpu.memory_space<vmem>>, %arg4: memref<128x128xbf16, #tpu.memory_space<vmem>>, %arg5: memref<128x128xf32, #tpu.memory_space<vmem>>, %arg6: memref<1x128xf32, #tpu.memory_space<vmem>>, %arg7: memref<8x128xf32, #tpu.memory_space<vmem>>, %arg8: memref<8x128xf32, #tpu.memory_space<vmem>>, %arg9: memref<8x128xf32, #tpu.memory_space<vmem>>, %arg10: memref<8x128xf32, #tpu.memory_space<vmem>>) attributes {dimension_semantics = [#tpu.dimension_semantics<parallel>, #tpu.dimension_semantics<arbitrary>], iteration_bounds = array<i64: 1, 1>, scalar_prefetch = 0 : i64, scratch_operands = 3 : i64, tpu.core_type = #tpu.core_type<tc>, window_params = [{transform_indices = @transform_0, window_bounds = array<i64: 1, 64, 32>}, {pipeline_mode = #tpu.pipeline_mode<synchronous>, transform_indices = @transform_1, window_bounds = array<i64: 32, 128>}, {pipeline_mode = #tpu.pipeline_mode<synchronous>, transform_indices = @transform_2, window_bounds = array<i64: 128, 128>}, {pipeline_mode = #tpu.pipeline_mode<synchronous>, transform_indices = @transform_3, window_bounds = array<i64: 128, 128>}, {pipeline_mode = #tpu.pipeline_mode<synchronous>, transform_indices = @transform_4, window_bounds = array<i64: 1, 128>}, {transform_indices = @transform_5, window_bounds = array<i64: 8, 128>}]} {
    %c0_i32 = arith.constant 0 : i32
    %0 = arith.cmpi eq, %arg1, %c0_i32 : i32
    %1 = arith.extui %0 : i1 to i32
    %c0_i32_0 = arith.constant 0 : i32
    %2 = arith.cmpi ne, %1, %c0_i32_0 : i32
    scf.if %2 {
      %cst_61 = arith.constant 0.000000e+00 : f32
      %153 = vector.broadcast %cst_61 : f32 to vector<8x128xf32>
      %c0_62 = arith.constant 0 : index
      %c0_63 = arith.constant 0 : index
      %154 = vector.load %arg8[%c0_62, %c0_63] : memref<8x128xf32, #tpu.memory_space<vmem>>, vector<8x128xf32>
      tpu.vector_store %arg8[%c0_62, %c0_63], %153 {strides = array<i32>} : memref<8x128xf32, #tpu.memory_space<vmem>>, vector<8x128xf32>,
      %cst_64 = arith.constant 0.000000e+00 : f32
      %155 = vector.broadcast %cst_64 : f32 to vector<8x128xf32>
      %c0_65 = arith.constant 0 : index
      %c0_66 = arith.constant 0 : index
      %156 = vector.load %arg9[%c0_65, %c0_66] : memref<8x128xf32, #tpu.memory_space<vmem>>, vector<8x128xf32>
      tpu.vector_store %arg9[%c0_65, %c0_66], %155 {strides = array<i32>} : memref<8x128xf32, #tpu.memory_space<vmem>>, vector<8x128xf32>,
      %cst_67 = arith.constant 0.000000e+00 : f32
      %157 = vector.broadcast %cst_67 : f32 to vector<8x128xf32>
      %c0_68 = arith.constant 0 : index
      %c0_69 = arith.constant 0 : index
      %158 = vector.load %arg10[%c0_68, %c0_69] : memref<8x128xf32, #tpu.memory_space<vmem>>, vector<8x128xf32>
      tpu.vector_store %arg10[%c0_68, %c0_69], %157 {strides = array<i32>} : memref<8x128xf32, #tpu.memory_space<vmem>>, vector<8x128xf32>,
    } else {
    }
    %c0 = arith.constant 0 : index
    %c0_1 = arith.constant 0 : index
    %c0_2 = arith.constant 0 : index
    %3 = vector.load %arg2[%c0, %c0_1, %c0_2] : memref<1x64x32xbf16, #tpu.memory_space<vmem>>, vector<1x64x32xbf16>
    %4 = vector.shape_cast %3 : vector<1x64x32xbf16> to vector<64x32xbf16>
    %c0_3 = arith.constant 0 : index
    %c0_4 = arith.constant 0 : index
    %5 = vector.load %arg3[%c0_3, %c0_4] : memref<32x128xbf16, #tpu.memory_space<vmem>>, vector<32x128xbf16>
    %cst = arith.constant dense<0.000000e+00> : vector<64x128xf32>
    %6 = tpu.matmul %4, %5, %cst {dimension_numbers = #tpu.dot_dimension_numbers<[1], [0], [0], [1], [0, 0, 1, 1], [], []>} : vector<64x32xbf16>, vector<32x128xbf16>, vector<64x128xf32> -> vector<64x128xf32>
    %c0_5 = arith.constant 0 : index
    %c0_6 = arith.constant 0 : index
    %7 = vector.load %arg8[%c0_5, %c0_6] : memref<8x128xf32, #tpu.memory_space<vmem>>, vector<8x128xf32>
    %c0_7 = arith.constant 0 : index
    %c0_8 = arith.constant 0 : index
    %8 = vector.load %arg9[%c0_7, %c0_8] : memref<8x128xf32, #tpu.memory_space<vmem>>, vector<8x128xf32>
    %c0_9 = arith.constant 0 : index
    %c0_10 = arith.constant 0 : index
    %9 = vector.load %arg10[%c0_9, %c0_10] : memref<8x128xf32, #tpu.memory_space<vmem>>, vector<8x128xf32>
    %c0_11 = arith.constant 0 : index
    %c0_12 = arith.constant 0 : index
    %10 = vector.load %arg4[%c0_11, %c0_12] : memref<128x128xbf16, #tpu.memory_space<vmem>>, vector<128x128xbf16>
    %11 = vector.extract_strided_slice %6 {offsets = [0, 0], sizes = [8, 128], strides = [1, 1]} : vector<64x128xf32> to vector<8x128xf32>
    %12 = arith.truncf %8 : vector<8x128xf32> to vector<8x128xbf16>
    %cst_13 = arith.constant dense<0.000000e+00> : vector<8x128xf32>
    %13 = tpu.matmul %12, %10, %cst_13 {dimension_numbers = #tpu.dot_dimension_numbers<[1], [0], [0], [1], [0, 0, 1, 1], [], []>} : vector<8x128xbf16>, vector<128x128xbf16>, vector<8x128xf32> -> vector<8x128xf32>
    %14 = arith.addf %11, %13 : vector<8x128xf32>
    %cst_14 = arith.constant 0.899999976 : f32
    %15 = vector.broadcast %cst_14 : f32 to vector<8x128xf32>
    %16 = arith.mulf %15, %7 : vector<8x128xf32>
    %cst_15 = arith.constant 1.000000e+00 : f32
    %17 = vector.broadcast %cst_15 : f32 to vector<8x128xf32>
    %18 = arith.subf %17, %8 : vector<8x128xf32>
    %19 = arith.mulf %16, %18 : vector<8x128xf32>
    %20 = arith.addf %19, %14 : vector<8x128xf32>
    %cst_16 = arith.constant 5.000000e-01 : f32
    %21 = vector.broadcast %cst_16 : f32 to vector<8x128xf32>
    %22 = arith.cmpf ogt, %20, %21 : vector<8x128xf32>
    %23 = arith.extui %22 : vector<8x128xi1> to vector<8x128xi32>
    %24 = arith.sitofp %23 : vector<8x128xi32> to vector<8x128xf32>
    %cst_17 = arith.constant 8.000000e-01 : f32
    %25 = vector.broadcast %cst_17 : f32 to vector<8x128xf32>
    %26 = arith.mulf %25, %9 : vector<8x128xf32>
    %27 = arith.addf %26, %24 : vector<8x128xf32>
    %28 = vector.extract_strided_slice %6 {offsets = [8, 0], sizes = [8, 128], strides = [1, 1]} : vector<64x128xf32> to vector<8x128xf32>
    %29 = arith.truncf %24 : vector<8x128xf32> to vector<8x128xbf16>
    %cst_18 = arith.constant dense<0.000000e+00> : vector<8x128xf32>
    %30 = tpu.matmul %29, %10, %cst_18 {dimension_numbers = #tpu.dot_dimension_numbers<[1], [0], [0], [1], [0, 0, 1, 1], [], []>} : vector<8x128xbf16>, vector<128x128xbf16>, vector<8x128xf32> -> vector<8x128xf32>
    %31 = arith.addf %28, %30 : vector<8x128xf32>
    %cst_19 = arith.constant 0.899999976 : f32
    %32 = vector.broadcast %cst_19 : f32 to vector<8x128xf32>
    %33 = arith.mulf %32, %20 : vector<8x128xf32>
    %cst_20 = arith.constant 1.000000e+00 : f32
    %34 = vector.broadcast %cst_20 : f32 to vector<8x128xf32>
    %35 = arith.subf %34, %24 : vector<8x128xf32>
    %36 = arith.mulf %33, %35 : vector<8x128xf32>
    %37 = arith.addf %36, %31 : vector<8x128xf32>
    %cst_21 = arith.constant 5.000000e-01 : f32
    %38 = vector.broadcast %cst_21 : f32 to vector<8x128xf32>
    %39 = arith.cmpf ogt, %37, %38 : vector<8x128xf32>
    %40 = arith.extui %39 : vector<8x128xi1> to vector<8x128xi32>
    %41 = arith.sitofp %40 : vector<8x128xi32> to vector<8x128xf32>
    %cst_22 = arith.constant 8.000000e-01 : f32
    %42 = vector.broadcast %cst_22 : f32 to vector<8x128xf32>
    %43 = arith.mulf %42, %27 : vector<8x128xf32>
    %44 = arith.addf %43, %41 : vector<8x128xf32>
    %45 = vector.extract_strided_slice %6 {offsets = [16, 0], sizes = [8, 128], strides = [1, 1]} : vector<64x128xf32> to vector<8x128xf32>
    %46 = arith.truncf %41 : vector<8x128xf32> to vector<8x128xbf16>
    %cst_23 = arith.constant dense<0.000000e+00> : vector<8x128xf32>
    %47 = tpu.matmul %46, %10, %cst_23 {dimension_numbers = #tpu.dot_dimension_numbers<[1], [0], [0], [1], [0, 0, 1, 1], [], []>} : vector<8x128xbf16>, vector<128x128xbf16>, vector<8x128xf32> -> vector<8x128xf32>
    %48 = arith.addf %45, %47 : vector<8x128xf32>
    %cst_24 = arith.constant 0.899999976 : f32
    %49 = vector.broadcast %cst_24 : f32 to vector<8x128xf32>
    %50 = arith.mulf %49, %37 : vector<8x128xf32>
    %cst_25 = arith.constant 1.000000e+00 : f32
    %51 = vector.broadcast %cst_25 : f32 to vector<8x128xf32>
    %52 = arith.subf %51, %41 : vector<8x128xf32>
    %53 = arith.mulf %50, %52 : vector<8x128xf32>
    %54 = arith.addf %53, %48 : vector<8x128xf32>
    %cst_26 = arith.constant 5.000000e-01 : f32
    %55 = vector.broadcast %cst_26 : f32 to vector<8x128xf32>
    %56 = arith.cmpf ogt, %54, %55 : vector<8x128xf32>
    %57 = arith.extui %56 : vector<8x128xi1> to vector<8x128xi32>
    %58 = arith.sitofp %57 : vector<8x128xi32> to vector<8x128xf32>
    %cst_27 = arith.constant 8.000000e-01 : f32
    %59 = vector.broadcast %cst_27 : f32 to vector<8x128xf32>
    %60 = arith.mulf %59, %44 : vector<8x128xf32>
    %61 = arith.addf %60, %58 : vector<8x128xf32>
    %62 = vector.extract_strided_slice %6 {offsets = [24, 0], sizes = [8, 128], strides = [1, 1]} : vector<64x128xf32> to vector<8x128xf32>
    %63 = arith.truncf %58 : vector<8x128xf32> to vector<8x128xbf16>
    %cst_28 = arith.constant dense<0.000000e+00> : vector<8x128xf32>
    %64 = tpu.matmul %63, %10, %cst_28 {dimension_numbers = #tpu.dot_dimension_numbers<[1], [0], [0], [1], [0, 0, 1, 1], [], []>} : vector<8x128xbf16>, vector<128x128xbf16>, vector<8x128xf32> -> vector<8x128xf32>
    %65 = arith.addf %62, %64 : vector<8x128xf32>
    %cst_29 = arith.constant 0.899999976 : f32
    %66 = vector.broadcast %cst_29 : f32 to vector<8x128xf32>
    %67 = arith.mulf %66, %54 : vector<8x128xf32>
    %cst_30 = arith.constant 1.000000e+00 : f32
    %68 = vector.broadcast %cst_30 : f32 to vector<8x128xf32>
    %69 = arith.subf %68, %58 : vector<8x128xf32>
    %70 = arith.mulf %67, %69 : vector<8x128xf32>
    %71 = arith.addf %70, %65 : vector<8x128xf32>
    %cst_31 = arith.constant 5.000000e-01 : f32
    %72 = vector.broadcast %cst_31 : f32 to vector<8x128xf32>
    %73 = arith.cmpf ogt, %71, %72 : vector<8x128xf32>
    %74 = arith.extui %73 : vector<8x128xi1> to vector<8x128xi32>
    %75 = arith.sitofp %74 : vector<8x128xi32> to vector<8x128xf32>
    %cst_32 = arith.constant 8.000000e-01 : f32
    %76 = vector.broadcast %cst_32 : f32 to vector<8x128xf32>
    %77 = arith.mulf %76, %61 : vector<8x128xf32>
    %78 = arith.addf %77, %75 : vector<8x128xf32>
    %79 = vector.extract_strided_slice %6 {offsets = [32, 0], sizes = [8, 128], strides = [1, 1]} : vector<64x128xf32> to vector<8x128xf32>
    %80 = arith.truncf %75 : vector<8x128xf32> to vector<8x128xbf16>
    %cst_33 = arith.constant dense<0.000000e+00> : vector<8x128xf32>
    %81 = tpu.matmul %80, %10, %cst_33 {dimension_numbers = #tpu.dot_dimension_numbers<[1], [0], [0], [1], [0, 0, 1, 1], [], []>} : vector<8x128xbf16>, vector<128x128xbf16>, vector<8x128xf32> -> vector<8x128xf32>
    %82 = arith.addf %79, %81 : vector<8x128xf32>
    %cst_34 = arith.constant 0.899999976 : f32
    %83 = vector.broadcast %cst_34 : f32 to vector<8x128xf32>
    %84 = arith.mulf %83, %71 : vector<8x128xf32>
    %cst_35 = arith.constant 1.000000e+00 : f32
    %85 = vector.broadcast %cst_35 : f32 to vector<8x128xf32>
    %86 = arith.subf %85, %75 : vector<8x128xf32>
    %87 = arith.mulf %84, %86 : vector<8x128xf32>
    %88 = arith.addf %87, %82 : vector<8x128xf32>
    %cst_36 = arith.constant 5.000000e-01 : f32
    %89 = vector.broadcast %cst_36 : f32 to vector<8x128xf32>
    %90 = arith.cmpf ogt, %88, %89 : vector<8x128xf32>
    %91 = arith.extui %90 : vector<8x128xi1> to vector<8x128xi32>
    %92 = arith.sitofp %91 : vector<8x128xi32> to vector<8x128xf32>
    %cst_37 = arith.constant 8.000000e-01 : f32
    %93 = vector.broadcast %cst_37 : f32 to vector<8x128xf32>
    %94 = arith.mulf %93, %78 : vector<8x128xf32>
    %95 = arith.addf %94, %92 : vector<8x128xf32>
    %96 = vector.extract_strided_slice %6 {offsets = [40, 0], sizes = [8, 128], strides = [1, 1]} : vector<64x128xf32> to vector<8x128xf32>
    %97 = arith.truncf %92 : vector<8x128xf32> to vector<8x128xbf16>
    %cst_38 = arith.constant dense<0.000000e+00> : vector<8x128xf32>
    %98 = tpu.matmul %97, %10, %cst_38 {dimension_numbers = #tpu.dot_dimension_numbers<[1], [0], [0], [1], [0, 0, 1, 1], [], []>} : vector<8x128xbf16>, vector<128x128xbf16>, vector<8x128xf32> -> vector<8x128xf32>
    %99 = arith.addf %96, %98 : vector<8x128xf32>
    %cst_39 = arith.constant 0.899999976 : f32
    %100 = vector.broadcast %cst_39 : f32 to vector<8x128xf32>
    %101 = arith.mulf %100, %88 : vector<8x128xf32>
    %cst_40 = arith.constant 1.000000e+00 : f32
    %102 = vector.broadcast %cst_40 : f32 to vector<8x128xf32>
    %103 = arith.subf %102, %92 : vector<8x128xf32>
    %104 = arith.mulf %101, %103 : vector<8x128xf32>
    %105 = arith.addf %104, %99 : vector<8x128xf32>
    %cst_41 = arith.constant 5.000000e-01 : f32
    %106 = vector.broadcast %cst_41 : f32 to vector<8x128xf32>
    %107 = arith.cmpf ogt, %105, %106 : vector<8x128xf32>
    %108 = arith.extui %107 : vector<8x128xi1> to vector<8x128xi32>
    %109 = arith.sitofp %108 : vector<8x128xi32> to vector<8x128xf32>
    %cst_42 = arith.constant 8.000000e-01 : f32
    %110 = vector.broadcast %cst_42 : f32 to vector<8x128xf32>
    %111 = arith.mulf %110, %95 : vector<8x128xf32>
    %112 = arith.addf %111, %109 : vector<8x128xf32>
    %113 = vector.extract_strided_slice %6 {offsets = [48, 0], sizes = [8, 128], strides = [1, 1]} : vector<64x128xf32> to vector<8x128xf32>
    %114 = arith.truncf %109 : vector<8x128xf32> to vector<8x128xbf16>
    %cst_43 = arith.constant dense<0.000000e+00> : vector<8x128xf32>
    %115 = tpu.matmul %114, %10, %cst_43 {dimension_numbers = #tpu.dot_dimension_numbers<[1], [0], [0], [1], [0, 0, 1, 1], [], []>} : vector<8x128xbf16>, vector<128x128xbf16>, vector<8x128xf32> -> vector<8x128xf32>
    %116 = arith.addf %113, %115 : vector<8x128xf32>
    %cst_44 = arith.constant 0.899999976 : f32
    %117 = vector.broadcast %cst_44 : f32 to vector<8x128xf32>
    %118 = arith.mulf %117, %105 : vector<8x128xf32>
    %cst_45 = arith.constant 1.000000e+00 : f32
    %119 = vector.broadcast %cst_45 : f32 to vector<8x128xf32>
    %120 = arith.subf %119, %109 : vector<8x128xf32>
    %121 = arith.mulf %118, %120 : vector<8x128xf32>
    %122 = arith.addf %121, %116 : vector<8x128xf32>
    %cst_46 = arith.constant 5.000000e-01 : f32
    %123 = vector.broadcast %cst_46 : f32 to vector<8x128xf32>
    %124 = arith.cmpf ogt, %122, %123 : vector<8x128xf32>
    %125 = arith.extui %124 : vector<8x128xi1> to vector<8x128xi32>
    %126 = arith.sitofp %125 : vector<8x128xi32> to vector<8x128xf32>
    %cst_47 = arith.constant 8.000000e-01 : f32
    %127 = vector.broadcast %cst_47 : f32 to vector<8x128xf32>
    %128 = arith.mulf %127, %112 : vector<8x128xf32>
    %129 = arith.addf %128, %126 : vector<8x128xf32>
    %130 = vector.extract_strided_slice %6 {offsets = [56, 0], sizes = [8, 128], strides = [1, 1]} : vector<64x128xf32> to vector<8x128xf32>
    %131 = arith.truncf %126 : vector<8x128xf32> to vector<8x128xbf16>
    %cst_48 = arith.constant dense<0.000000e+00> : vector<8x128xf32>
    %132 = tpu.matmul %131, %10, %cst_48 {dimension_numbers = #tpu.dot_dimension_numbers<[1], [0], [0], [1], [0, 0, 1, 1], [], []>} : vector<8x128xbf16>, vector<128x128xbf16>, vector<8x128xf32> -> vector<8x128xf32>
    %133 = arith.addf %130, %132 : vector<8x128xf32>
    %cst_49 = arith.constant 0.899999976 : f32
    %134 = vector.broadcast %cst_49 : f32 to vector<8x128xf32>
    %135 = arith.mulf %134, %122 : vector<8x128xf32>
    %cst_50 = arith.constant 1.000000e+00 : f32
    %136 = vector.broadcast %cst_50 : f32 to vector<8x128xf32>
    %137 = arith.subf %136, %126 : vector<8x128xf32>
    %138 = arith.mulf %135, %137 : vector<8x128xf32>
    %139 = arith.addf %138, %133 : vector<8x128xf32>
    %cst_51 = arith.constant 5.000000e-01 : f32
    %140 = vector.broadcast %cst_51 : f32 to vector<8x128xf32>
    %141 = arith.cmpf ogt, %139, %140 : vector<8x128xf32>
    %142 = arith.extui %141 : vector<8x128xi1> to vector<8x128xi32>
    %143 = arith.sitofp %142 : vector<8x128xi32> to vector<8x128xf32>
    %cst_52 = arith.constant 8.000000e-01 : f32
    %144 = vector.broadcast %cst_52 : f32 to vector<8x128xf32>
    %145 = arith.mulf %144, %129 : vector<8x128xf32>
    %146 = arith.addf %145, %143 : vector<8x128xf32>
    %c0_53 = arith.constant 0 : index
    %c0_54 = arith.constant 0 : index
    %147 = vector.load %arg8[%c0_53, %c0_54] : memref<8x128xf32, #tpu.memory_space<vmem>>, vector<8x128xf32>
    tpu.vector_store %arg8[%c0_53, %c0_54], %139 {strides = array<i32>} : memref<8x128xf32, #tpu.memory_space<vmem>>, vector<8x128xf32>,
    %c0_55 = arith.constant 0 : index
    %c0_56 = arith.constant 0 : index
    %148 = vector.load %arg9[%c0_55, %c0_56] : memref<8x128xf32, #tpu.memory_space<vmem>>, vector<8x128xf32>
    tpu.vector_store %arg9[%c0_55, %c0_56], %143 {strides = array<i32>} : memref<8x128xf32, #tpu.memory_space<vmem>>, vector<8x128xf32>,
    %c0_57 = arith.constant 0 : index
    %c0_58 = arith.constant 0 : index
    %149 = vector.load %arg10[%c0_57, %c0_58] : memref<8x128xf32, #tpu.memory_space<vmem>>, vector<8x128xf32>
    tpu.vector_store %arg10[%c0_57, %c0_58], %146 {strides = array<i32>} : memref<8x128xf32, #tpu.memory_space<vmem>>, vector<8x128xf32>,
    %c0_i32_59 = arith.constant 0 : i32
    %150 = arith.cmpi eq, %arg1, %c0_i32_59 : i32
    %151 = arith.extui %150 : i1 to i32
    %c0_i32_60 = arith.constant 0 : i32
    %152 = arith.cmpi ne, %151, %c0_i32_60 : i32
    scf.if %152 {
      %c0_61 = arith.constant 0 : index
      %c0_62 = arith.constant 0 : index
      %153 = vector.load %arg5[%c0_61, %c0_62] : memref<128x128xf32, #tpu.memory_space<vmem>>, vector<128x128xf32>
      %cst_63 = arith.constant dense<0.000000e+00> : vector<8x128xf32>
      %154 = tpu.matmul %146, %153, %cst_63 {dimension_numbers = #tpu.dot_dimension_numbers<[1], [0], [0], [1], [0, 0, 1, 1], [], []>} : vector<8x128xf32>, vector<128x128xf32>, vector<8x128xf32> -> vector<8x128xf32>
      %c0_64 = arith.constant 0 : index
      %c0_65 = arith.constant 0 : index
      %155 = vector.load %arg6[%c0_64, %c0_65] : memref<1x128xf32, #tpu.memory_space<vmem>>, vector<1x128xf32>
      %cst_66 = arith.constant 4.16113901 : f32
      %156 = vector.broadcast %cst_66 : f32 to vector<1x128xf32>
      %157 = arith.mulf %156, %155 : vector<1x128xf32>
      %158 = vector.broadcast %157 : vector<1x128xf32> to vector<8x128xf32>
      %159 = arith.addf %154, %158 : vector<8x128xf32>
      %cst_67 = arith.constant 1.250000e-01 : f32
      %160 = vector.broadcast %cst_67 : f32 to vector<8x128xf32>
      %161 = arith.mulf %159, %160 : vector<8x128xf32>
      %162 = tpu.iota {dimensions = array<i32: 1>} : vector<8x128xi32>
      %c4_i32 = arith.constant 4 : i32
      %163 = vector.broadcast %c4_i32 : i32 to vector<8x128xi32>
      %164 = arith.cmpi slt, %162, %163 : vector<8x128xi32>
      %cst_68 = arith.constant -1.000000e+30 : f32
      %165 = vector.broadcast %cst_68 : f32 to vector<8x128xf32>
      %166 = arith.select %164, %161, %165 : vector<8x128xi1>, vector<8x128xf32>
      %cst_69 = arith.constant dense<0xFF800000> : vector<8xf32>
      %167 = vector.multi_reduction <maximumf>, %166, %cst_69 [1] : vector<8x128xf32> to vector<8xf32>
      %168 = vector.shape_cast %167 : vector<8xf32> to vector<8x1xf32>
      %169 = vector.broadcast %168 : vector<8x1xf32> to vector<8x128xf32>
      %170 = arith.subf %166, %169 : vector<8x128xf32>
      %171 = math.exp %170 : vector<8x128xf32>
      %cst_70 = arith.constant dense<0.000000e+00> : vector<8xf32>
      %172 = vector.multi_reduction <add>, %171, %cst_70 [1] : vector<8x128xf32> to vector<8xf32>
      %173 = vector.shape_cast %172 : vector<8xf32> to vector<8x1xf32>
      %174 = vector.broadcast %173 : vector<8x1xf32> to vector<8x128xf32>
      %175 = arith.divf %171, %174 : vector<8x128xf32>
      %c0_71 = arith.constant 0 : index
      %c0_72 = arith.constant 0 : index
      %176 = vector.load %arg7[%c0_71, %c0_72] : memref<8x128xf32, #tpu.memory_space<vmem>>, vector<8x128xf32>
      tpu.vector_store %arg7[%c0_71, %c0_72], %175 {strides = array<i32>} : memref<8x128xf32, #tpu.memory_space<vmem>>, vector<8x128xf32>,
    } else {
    }
    return
  }
  func.func @transform_0(%arg0: i32, %arg1: i32) -> (i32, i32, i32) {
    %c0_i32 = arith.constant 0 : i32
    %c0_i32_0 = arith.constant 0 : i32
    return %arg0, %arg1, %c0_i32 : i32, i32, i32
  }
  func.func @transform_1(%arg0: i32, %arg1: i32) -> (i32, i32) {
    %c0_i32 = arith.constant 0 : i32
    %c0_i32_0 = arith.constant 0 : i32
    %c0_i32_1 = arith.constant 0 : i32
    return %c0_i32, %c0_i32_0 : i32, i32
  }
  func.func @transform_2(%arg0: i32, %arg1: i32) -> (i32, i32) {
    %c0_i32 = arith.constant 0 : i32
    %c0_i32_0 = arith.constant 0 : i32
    %c0_i32_1 = arith.constant 0 : i32
    return %c0_i32, %c0_i32_0 : i32, i32
  }
  func.func @transform_3(%arg0: i32, %arg1: i32) -> (i32, i32) {
    %c0_i32 = arith.constant 0 : i32
    %c0_i32_0 = arith.constant 0 : i32
    %c0_i32_1 = arith.constant 0 : i32
    return %c0_i32, %c0_i32_0 : i32, i32
  }
  func.func @transform_4(%arg0: i32, %arg1: i32) -> (i32, i32) {
    %c0_i32 = arith.constant 0 : i32
    %c0_i32_0 = arith.constant 0 : i32
    %c0_i32_1 = arith.constant 0 : i32
    return %c0_i32, %c0_i32_0 : i32, i32
  }
  func.func @transform_5(%arg0: i32, %arg1: i32) -> (i32, i32) {
    %c0_i32 = arith.constant 0 : i32
    %c0_i32_0 = arith.constant 0 : i32
    return %arg0, %c0_i32 : i32, i32
  }
}

</mosaic_0001>

<bundles_post_ra>
// kernel: _spasnn_forward.1
= control target key start
LH: loop header
LB: loop body
LE: loop exit
PB: predicated region body
PF: predicated region fallthrough
CT: control target
= control target key end

     0   :  { %v1132_v0 = vmov 0.0   ;;  %vm1133_vm0 = vmmov 0   ;;  %vm72_vm1 = vcmask 261120   ;;  %v1134_v15 = vmov 0.0|0.0   ;;  %s1470_s2 = inlined_call_operand.vmem [shape: bf16[128,128], index: 2, kind: input, shape index: {}]   ;;  %s1471_s1 = inlined_call_operand.vmem [shape: bf16[32,128], index: 1, kind: input, shape index: {}]   ;;  %s1472_s0 = inlined_call_operand.vmem [shape: bf16[1,64,32], index: 0, kind: input, shape index: {}]   ;;  %s1473_s3 = inlined_call_operand.vmem [shape: f32[128,128], index: 3, kind: input, shape index: {}]   ;;  %s1474_s4 = inlined_call_operand.vmem [shape: f32[1,128], index: 4, kind: input, shape index: {}]   ;;  %s1475_s5 = inlined_call_operand.vmem [shape: f32[8,128], index: 5, kind: output, shape index: {}]  }
   0x1   :  { %891 = vmatprep.subr.bf16.mxu1 %v1132_v0  ;;  %v1170_v1 = vld [vmem:[%s1470_s2] sm:$0xff]   ;;  %907 = vmatprep.mubr.msk.bf16.mxu1 %vm1133_vm0, %v1132_v0  ;;  %v1178_v2 = vld [vmem:[%s1470_s2 + $0x8] sm:$0xff]   ;;  %v1188_v4 = vld [vmem:[%s1470_s2 + $0x10] sm:$0xff]   ;;  %v1135_v32 = vmov 1.0|1.0  }
   0x2   :  { %892 = vmatpush3.bf16.msra.mxu1 %v1170_v1  ;;  %v1119_v3 = vld [vmem:[%s1471_s1] sm:$0xff]   ;;  %v1121_v5 = vld [vmem:[%s1471_s1 + $0x8] sm:$0xff]   ;;  %v1201_v7 = vld [vmem:[%s1470_s2 + $0x18] sm:$0xff]  }
   0x3   :  { %893 = vmatprep.subr.bf16.mxu1 %v1132_v0  ;;  %879 = vmatprep.subr.bf16.mxu0 %v1119_v3  ;;  %v1123_v6 = vld [vmem:[%s1472_s0] sm:$0xff]   ;;  %v1124_v8 = vld [vmem:[%s1472_s0 + $0x8] sm:$0xff]   ;;  %v1126_v9 = vld [vmem:[%s1472_s0 + $0x10] sm:$0xff]  }
   0x4   :  { %880 = vmatpush3.bf16.msra.mxu0 %v1119_v3  ;;  %883 = vmatprep.mubr.msk.bf16.mxu0 %vm72_vm1, %v1123_v6  ;;  %v1216_v10 = vld [vmem:[%s1470_s2 + $0x20] sm:$0xff]   ;;  %v1227_v11 = vld [vmem:[%s1470_s2 + $0x28] sm:$0xff]   ;;  %v1127_v12 = vld [vmem:[%s1472_s0 + $0x18] sm:$0xff]  }
   0x5   :  { %881 = vmatprep.subr.bf16.mxu0 %v1121_v5  ;;  %v1239_v13 = vld [vmem:[%s1470_s2 + $0x30] sm:$0xff]   ;;  %v1251_v14 = vld [vmem:[%s1470_s2 + $0x38] sm:$0xff]  }
   0x6   :  { %894 = vmatpush3.bf16.msra.mxu1 %v1178_v2 }
   0x7   :  { %895 = vmatprep.subr.bf16.mxu1 %v1132_v0 }
   0x8   :  { %882 = vmatpush3.bf16.msra.mxu0 %v1121_v5 }
   0x9   :  { %911 = vmatprep.subr.bf16.mxu0 %v1132_v0 }
   0xa   :  { %896 = vmatpush3.bf16.msra.mxu1 %v1188_v4 }
   0xb   :  { %897 = vmatprep.subr.bf16.mxu1 %v1132_v0  ;;  %884 = vmatmul.mubr.msk.bf16.vlgmr.msra.gmra.mrb[0].mxu0 %vm72_vm1, %v1124_v8 }
   0xc   :  { %912 = vmatpush3.bf16.msra.mxu0 %v1170_v1  ;;  %887 = vmatprep.mubr.msk.bf16.mxu0 %vm72_vm1, %v1126_v9 }
   0xd   :  { %913 = vmatprep.subr.bf16.mxu0 %v1132_v0 }
   0xe   :  { %898 = vmatpush3.bf16.msra.mxu1 %v1201_v7 }
   0xf   :  { %899 = vmatprep.subr.bf16.mxu1 %v1132_v0 }
  0x10   :  { %914 = vmatpush3.bf16.msra.mxu0 %v1178_v2 }
  0x11   :  { %915 = vmatprep.subr.bf16.mxu0 %v1132_v0 }
  0x12   :  { %900 = vmatpush3.bf16.msra.mxu1 %v1216_v10 }
  0x13   :  { %901 = vmatprep.subr.bf16.mxu1 %v1132_v0  ;;  %888 = vmatmul.mubr.msk.bf16.gmra.mrb[4].mxu0 %vm72_vm1, %v1127_v12 }
  0x14   :  { %916 = vmatpush3.bf16.msra.mxu0 %v1188_v4  ;;  %927 = vmatprep.mubr.msk.bf16.mxu0 %vm1133_vm0, %v1132_v0 }
  0x15   :  { %917 = vmatprep.subr.bf16.mxu0 %v1132_v0 }
  0x16   :  { %902 = vmatpush3.bf16.msra.mxu1 %v1227_v11 }
  0x17   :  { %903 = vmatprep.subr.bf16.mxu1 %v1132_v0 }
  0x18   :  { %918 = vmatpush3.bf16.msra.mxu0 %v1201_v7 }
  0x19   :  { %919 = vmatprep.subr.bf16.mxu0 %v1132_v0 }
  0x1a   :  { %904 = vmatpush3.bf16.msra.mxu1 %v1239_v13 }
  0x1b   :  { %905 = vmatprep.subr.bf16.mxu1 %v1132_v0 }
  0x1c   :  { %920 = vmatpush3.bf16.msra.mxu0 %v1216_v10 }
  0x1d   :  { %921 = vmatprep.subr.bf16.mxu0 %v1132_v0 }
  0x1e   :  { %906 = vmatpush3.bf16.msra.mxu1 %v1251_v14 }
  0x1f   :  { %931 = vmatprep.subr.bf16.mxu1 %v1132_v0 }
  0x20   :  { %922 = vmatpush3.bf16.msra.mxu0 %v1227_v11 }
  0x21   :  { %908 = vmatmul.mubr.bf16.vlgmr.msra.gmra.mrb[0].mxu1 %v1134_v15  ;;  %923 = vmatprep.subr.bf16.mxu0 %v1132_v0 }
  0x22   :  { %932 = vmatpush3.bf16.msra.mxu1 %v1170_v1  ;;  %947 = vmatprep.mubr.msk.bf16.mxu1 %vm1133_vm0, %v1132_v0 }
  0x23   :  { %933 = vmatprep.subr.bf16.mxu1 %v1132_v0 }
  0x24   :  { %924 = vmatpush3.bf16.msra.mxu0 %v1239_v13 }
  0x25   :  { %925 = vmatprep.subr.bf16.mxu0 %v1132_v0 }
  0x26   :  { %934 = vmatpush3.bf16.msra.mxu1 %v1178_v2 }
  0x27   :  { %935 = vmatprep.subr.bf16.mxu1 %v1132_v0 }
  0x28   :  { %926 = vmatpush3.bf16.msra.mxu0 %v1251_v14 }
  0x29   :  { %951 = vmatprep.subr.bf16.mxu0 %v1132_v0 }
  0x2a   :  { %936 = vmatpush3.bf16.msra.mxu1 %v1188_v4 }
  0x2b   :  { %937 = vmatprep.subr.bf16.mxu1 %v1132_v0 }
  0x2e   :  { %938 = vmatpush3.bf16.msra.mxu1 %v1201_v7 }
  0x2f   :  { %939 = vmatprep.subr.bf16.mxu1 %v1132_v0 }
  0x32   :  { %940 = vmatpush3.bf16.msra.mxu1 %v1216_v10 }
  0x33   :  { %941 = vmatprep.subr.bf16.mxu1 %v1132_v0 }
  0x36   :  { %942 = vmatpush3.bf16.msra.mxu1 %v1227_v11 }
  0x37   :  { %943 = vmatprep.subr.bf16.mxu1 %v1132_v0 }
  0x3a   :  { %944 = vmatpush3.bf16.msra.mxu1 %v1239_v13 }
  0x3b   :  { %945 = vmatprep.subr.bf16.mxu1 %v1132_v0 }
  0x3e   :  { %946 = vmatpush3.bf16.msra.mxu1 %v1251_v14 }
  0x3f   :  { %971 = vmatprep.subr.bf16.mxu1 %v1132_v0 }
  0xde   :  { %v1285_v16 = vpop.f32.mrb[0].mxu0 }
  0xdf   :  { %v119_v17 = vpop.f32.mrb[1].mxu0 }
  0xe0   :  { %v1287_v18 = vpop.f32.mrb[2].mxu0 }
  0xe1   :  { %v122_v19 = vpop.f32.mrb[3].mxu0 }
  0xe6   :  { %v1289_v20 = vpop.f32.mrb[4].mxu0 }
  0xe7   :  { %v1291_v21 = vpop.f32.mrb[5].mxu0 }
  0xe8   :  { %v1293_v22 = vpop.f32.mrb[6].mxu0 }
  0xe9   :  { %v1295_v23 = vpop.f32.mrb[7].mxu0 }
  0xf4   :  { %v252_v24 = vpop.f32.mrb[0].mxu1 }
  0xf5   :  { %v258_v25 = vadd.f32 %v252_v24, %v119_v17  ;;  %v909_v26 = vpop.f32.mrb[1].mxu1 }
  0xf6   :  { %v255_v27 = vpop.f32.mrb[2].mxu1 }
  0xf7   :  { %vm263_vm2 = vcmp.gt.f32.partialorder %v258_v25, 0.5  ;;  %v910_v28 = vpop.f32.mrb[3].mxu1  ;;  %v310_v30 = vmul.f32 0.9, %v258_v25 }
  0xf8   :  { %v762_v29 = vsel %vm263_vm2, 1.0, %v1132_v0  ;;  %vm763_vm3 = vmpackc.low %vm263_vm2, %vm263_vm2 }
  0xf9   :  { %v311_v31 = vsub.f32 1.0, %v762_v29  ;;  %928 = vmatmul.mubr.msk.bf16.vlgmr.msra.gmra.mrb[8].mxu0 %vm763_vm3, %v1135_v32  ;;  %v317_v40 = vmul.f32 0.8, %v762_v29 }
  0xfa   :  { %952 = vmatpush3.bf16.msra.mxu0 %v1170_v1  ;;  %967 = vmatprep.mubr.msk.bf16.mxu0 %vm1133_vm0, %v1132_v0 }
  0xfb   :  { %v312_v33 = vmul.f32 %v311_v31, %v310_v30  ;;  %953 = vmatprep.subr.bf16.mxu0 %v1132_v0 }
  0xfe   :  { %954 = vmatpush3.bf16.msra.mxu0 %v1178_v2 }
  0xff   :  { %955 = vmatprep.subr.bf16.mxu0 %v1132_v0 }
 0x102   :  { %956 = vmatpush3.bf16.msra.mxu0 %v1188_v4 }
 0x103   :  { %957 = vmatprep.subr.bf16.mxu0 %v1132_v0 }
 0x106   :  { %958 = vmatpush3.bf16.msra.mxu0 %v1201_v7 }
 0x107   :  { %959 = vmatprep.subr.bf16.mxu0 %v1132_v0 }
 0x10a   :  { %960 = vmatpush3.bf16.msra.mxu0 %v1216_v10 }
 0x10b   :  { %961 = vmatprep.subr.bf16.mxu0 %v1132_v0 }
 0x10e   :  { %962 = vmatpush3.bf16.msra.mxu0 %v1227_v11 }
 0x10f   :  { %963 = vmatprep.subr.bf16.mxu0 %v1132_v0 }
 0x112   :  { %964 = vmatpush3.bf16.msra.mxu0 %v1239_v13 }
 0x113   :  { %965 = vmatprep.subr.bf16.mxu0 %v1132_v0 }
 0x116   :  { %966 = vmatpush3.bf16.msra.mxu0 %v1251_v14 }
 0x117   :  { %991 = vmatprep.subr.bf16.mxu0 %v1132_v0 }
 0x1cc   :  { %v303_v34 = vpop.f32.mrb[8].mxu0 }
 0x1cd   :  { %v309_v35 = vadd.f32 %v303_v34, %v122_v19  ;;  %v929_v36 = vpop.f32.mrb[9].mxu0 }
 0x1ce   :  { %v306_v37 = vpop.f32.mrb[10].mxu0  ;;  %v632_v36 = vld [vmem:[%s1473_s3 + $0x8] sm:$0xff] }
 0x1cf   :  { %v313_v38 = vadd.f32 %v312_v33, %v309_v35  ;;  %v930_v39 = vpop.f32.mrb[11].mxu0  ;;  %v633_v37 = vld [vmem:[%s1473_s3 + $0x10] sm:$0xff] }
 0x1d0   :  { %v634_v39 = vld [vmem:[%s1473_s3 + $0x18] sm:$0xff] }
 0x1d1   :  { %vm314_vm4 = vcmp.gt.f32.partialorder %v313_v38, 0.5  ;;  %v361_v43 = vmul.f32 0.9, %v313_v38 }
 0x1d2   :  { %v765_v41 = vsel %vm314_vm4, 1.0, %v1132_v0  ;;  %vm766_vm5 = vmpackc.low %vm314_vm4, %vm314_vm4 }
 0x1d3   :  { %v318_v42 = vadd.f32 %v765_v41, %v317_v40  ;;  %948 = vmatmul.mubr.msk.bf16.vlgmr.msra.gmra.mrb[4].mxu1 %vm766_vm5, %v1135_v32  ;;  %v362_v44 = vsub.f32 1.0, %v765_v41  ;;  %v1090_v40 = vpack.c.bf16 %v634_v39, %v633_v37  ;;  %v635_v41 = vld [vmem:[%s1473_s3 + $0x20] sm:$0xff] }
 0x1d4   :  { %972 = vmatpush3.bf16.msra.mxu1 %v1170_v1  ;;  %987 = vmatprep.mubr.msk.bf16.mxu1 %vm1133_vm0, %v1132_v0 }
 0x1d5   :  { %v363_v45 = vmul.f32 %v362_v44, %v361_v43  ;;  %973 = vmatprep.subr.bf16.mxu1 %v1132_v0  ;;  %v368_v52 = vmul.f32 0.8, %v318_v42  ;;  %v636_v42 = vld [vmem:[%s1473_s3 + $0x28] sm:$0xff]  ;;  %v637_v44 = vld [vmem:[%s1473_s3 + $0x30] sm:$0xff] }
 0x1d6   :  { %v1093_v43 = vpack.c.bf16 %v636_v42, %v635_v41 }
 0x1d8   :  { %974 = vmatpush3.bf16.msra.mxu1 %v1178_v2 }
 0x1d9   :  { %975 = vmatprep.subr.bf16.mxu1 %v1132_v0 }
 0x1dc   :  { %976 = vmatpush3.bf16.msra.mxu1 %v1188_v4 }
 0x1dd   :  { %977 = vmatprep.subr.bf16.mxu1 %v1132_v0 }
 0x1e0   :  { %978 = vmatpush3.bf16.msra.mxu1 %v1201_v7 }
 0x1e1   :  { %979 = vmatprep.subr.bf16.mxu1 %v1132_v0 }
 0x1e4   :  { %980 = vmatpush3.bf16.msra.mxu1 %v1216_v10 }
 0x1e5   :  { %981 = vmatprep.subr.bf16.mxu1 %v1132_v0 }
 0x1e8   :  { %982 = vmatpush3.bf16.msra.mxu1 %v1227_v11 }
 0x1e9   :  { %983 = vmatprep.subr.bf16.mxu1 %v1132_v0 }
 0x1ec   :  { %984 = vmatpush3.bf16.msra.mxu1 %v1239_v13 }
 0x1ed   :  { %985 = vmatprep.subr.bf16.mxu1 %v1132_v0 }
 0x1f0   :  { %986 = vmatpush3.bf16.msra.mxu1 %v1251_v14 }
 0x1f1   :  { %1011 = vmatprep.subr.bf16.mxu1 %v1132_v0 }
 0x2a6   :  { %v354_v46 = vpop.f32.mrb[4].mxu1 }
 0x2a7   :  { %v360_v47 = vadd.f32 %v1285_v16, %v354_v46  ;;  %v949_v48 = vpop.f32.mrb[5].mxu1 }
 0x2a8   :  { %v357_v49 = vpop.f32.mrb[6].mxu1  ;;  %v640_v48 = vld [vmem:[%s1473_s3 + $0x48] sm:$0xff] }
 0x2a9   :  { %v364_v50 = vadd.f32 %v363_v45, %v360_v47  ;;  %v950_v51 = vpop.f32.mrb[7].mxu1  ;;  %v638_v45 = vld [vmem:[%s1473_s3 + $0x38] sm:$0xff]  ;;  %v639_v47 = vld [vmem:[%s1473_s3 + $0x40] sm:$0xff] }
 0x2aa   :  { %v1096_v46 = vpack.c.bf16 %v638_v45, %v637_v44  ;;  %v1099_v49 = vpack.c.bf16 %v640_v48, %v639_v47  ;;  %v642_v51 = vld [vmem:[%s1473_s3 + $0x58] sm:$0xff] }
 0x2ab   :  { %vm365_vm6 = vcmp.gt.f32.partialorder %v364_v50, 0.5  ;;  %v412_v55 = vmul.f32 0.9, %v364_v50  ;;  %v641_v50 = vld [vmem:[%s1473_s3 + $0x50] sm:$0xff] }
 0x2ac   :  { %v768_v53 = vsel %vm365_vm6, 1.0, %v1132_v0  ;;  %vm769_vm7 = vmpackc.low %vm365_vm6, %vm365_vm6 }
 0x2ad   :  { %v369_v54 = vadd.f32 %v768_v53, %v368_v52  ;;  %968 = vmatmul.mubr.msk.bf16.vlgmr.msra.gmra.mrb[12].mxu0 %vm769_vm7, %v1135_v32  ;;  %v413_v56 = vsub.f32 1.0, %v768_v53  ;;  %v1102_v52 = vpack.c.bf16 %v642_v51, %v641_v50 }
 0x2ae   :  { %992 = vmatpush3.bf16.msra.mxu0 %v1170_v1  ;;  %1007 = vmatprep.mubr.msk.bf16.mxu0 %vm1133_vm0, %v1132_v0 }
 0x2af   :  { %v414_v57 = vmul.f32 %v413_v56, %v412_v55  ;;  %993 = vmatprep.subr.bf16.mxu0 %v1132_v0  ;;  %v419_v3 = vmul.f32 0.8, %v369_v54 }
 0x2b2   :  { %994 = vmatpush3.bf16.msra.mxu0 %v1178_v2 }
 0x2b3   :  { %995 = vmatprep.subr.bf16.mxu0 %v1132_v0 }
 0x2b6   :  { %996 = vmatpush3.bf16.msra.mxu0 %v1188_v4 }
 0x2b7   :  { %997 = vmatprep.subr.bf16.mxu0 %v1132_v0 }
 0x2ba   :  { %998 = vmatpush3.bf16.msra.mxu0 %v1201_v7 }
 0x2bb   :  { %999 = vmatprep.subr.bf16.mxu0 %v1132_v0 }
 0x2be   :  { %1000 = vmatpush3.bf16.msra.mxu0 %v1216_v10 }
 0x2bf   :  { %1001 = vmatprep.subr.bf16.mxu0 %v1132_v0 }
 0x2c2   :  { %1002 = vmatpush3.bf16.msra.mxu0 %v1227_v11 }
 0x2c3   :  { %1003 = vmatprep.subr.bf16.mxu0 %v1132_v0 }
 0x2c6   :  { %1004 = vmatpush3.bf16.msra.mxu0 %v1239_v13 }
 0x2c7   :  { %1005 = vmatprep.subr.bf16.mxu0 %v1132_v0 }
 0x2ca   :  { %1006 = vmatpush3.bf16.msra.mxu0 %v1251_v14 }
 0x2cb   :  { %1031 = vmatprep.subr.bf16.mxu0 %v1132_v0 }
 0x380   :  { %v405_v58 = vpop.f32.mrb[12].mxu0 }
 0x381   :  { %v411_v59 = vadd.f32 %v1287_v18, %v405_v58  ;;  %v969_v60 = vpop.f32.mrb[13].mxu0 }
 0x382   :  { %v408_v61 = vpop.f32.mrb[14].mxu0 }
 0x383   :  { %v415_v62 = vadd.f32 %v414_v57, %v411_v59  ;;  %v970_v63 = vpop.f32.mrb[15].mxu0 }
 0x385   :  { %vm416_vm8 = vcmp.gt.f32.partialorder %v415_v62, 0.5  ;;  %v463_v8 = vmul.f32 0.9, %v415_v62 }
 0x386   :  { %v771_v5 = vsel %vm416_vm8, 1.0, %v1132_v0  ;;  %vm772_vm9 = vmpackc.low %vm416_vm8, %vm416_vm8 }
 0x387   :  { %v420_v6 = vadd.f32 %v771_v5, %v419_v3  ;;  %988 = vmatmul.mubr.msk.bf16.vlgmr.msra.gmra.mrb[8].mxu1 %vm772_vm9, %v1135_v32  ;;  %v464_v9 = vsub.f32 1.0, %v771_v5  ;;  %v643_v5 = vld [vmem:[%s1473_s3 + $0x60] sm:$0xff] }
 0x388   :  { %1012 = vmatpush3.bf16.msra.mxu1 %v1170_v1  ;;  %1027 = vmatprep.mubr.msk.bf16.mxu1 %vm1133_vm0, %v1132_v0 }
 0x389   :  { %v465_v12 = vmul.f32 %v464_v9, %v463_v8  ;;  %1013 = vmatprep.subr.bf16.mxu1 %v1132_v0  ;;  %v470_v26 = vmul.f32 0.8, %v420_v6  ;;  %v645_v8 = vld [vmem:[%s1473_s3 + $0x70] sm:$0xff] }
 0x38c   :  { %1014 = vmatpush3.bf16.msra.mxu1 %v1178_v2 }
 0x38d   :  { %1015 = vmatprep.subr.bf16.mxu1 %v1132_v0 }
 0x390   :  { %1016 = vmatpush3.bf16.msra.mxu1 %v1188_v4 }
 0x391   :  { %1017 = vmatprep.subr.bf16.mxu1 %v1132_v0 }
 0x394   :  { %1018 = vmatpush3.bf16.msra.mxu1 %v1201_v7 }
 0x395   :  { %1019 = vmatprep.subr.bf16.mxu1 %v1132_v0 }
 0x398   :  { %1020 = vmatpush3.bf16.msra.mxu1 %v1216_v10 }
 0x399   :  { %1021 = vmatprep.subr.bf16.mxu1 %v1132_v0 }
 0x39c   :  { %1022 = vmatpush3.bf16.msra.mxu1 %v1227_v11 }
 0x39d   :  { %1023 = vmatprep.subr.bf16.mxu1 %v1132_v0 }
 0x3a0   :  { %1024 = vmatpush3.bf16.msra.mxu1 %v1239_v13 }
 0x3a1   :  { %1025 = vmatprep.subr.bf16.mxu1 %v1132_v0 }
 0x3a4   :  { %1026 = vmatpush3.bf16.msra.mxu1 %v1251_v14 }
 0x3a5   :  { %1086 = vmatprep.subr.bf16.mxu1 %v1134_v15 }
 0x45a   :  { %v456_v16 = vpop.f32.mrb[8].mxu1 }
 0x45b   :  { %v462_v17 = vadd.f32 %v456_v16, %v1291_v21  ;;  %v989_v18 = vpop.f32.mrb[9].mxu1 }
 0x45c   :  { %v459_v19 = vpop.f32.mrb[10].mxu1 }
 0x45d   :  { %v466_v24 = vadd.f32 %v465_v12, %v462_v17  ;;  %v990_v25 = vpop.f32.mrb[11].mxu1 }
 0x45f   :  { %vm467_vm10 = vcmp.gt.f32.partialorder %v466_v24, 0.5  ;;  %v514_v29 = vmul.f32 0.9, %v466_v24 }
 0x460   :  { %v774_v27 = vsel %vm467_vm10, 1.0, %v1132_v0  ;;  %vm775_vm11 = vmpackc.low %vm467_vm10, %vm467_vm10 }
 0x461   :  { %v471_v28 = vadd.f32 %v774_v27, %v470_v26  ;;  %1008 = vmatmul.mubr.msk.bf16.vlgmr.msra.gmra.mrb[16].mxu0 %vm775_vm11, %v1135_v32  ;;  %v515_v30 = vsub.f32 1.0, %v774_v27  ;;  %v650_v27 = vlaneseq }
 0x462   :  { %1032 = vmatpush3.bf16.msra.mxu0 %v1170_v1  ;;  %1047 = vmatprep.mubr.msk.bf16.mxu0 %vm1133_vm0, %v1132_v0 }
 0x463   :  { %v516_v21 = vmul.f32 %v515_v30, %v514_v29  ;;  %1033 = vmatprep.subr.bf16.mxu0 %v1132_v0  ;;  %v647_v29 = vld [vmem:[%s1474_s4] sm:$0x1] }
 0x464   :  { %v648_v30 = vmul.f32 4.161139, %v647_v29 }
 0x466   :  { %1034 = vmatpush3.bf16.msra.mxu0 %v1178_v2 }
 0x467   :  { %1035 = vmatprep.subr.bf16.mxu0 %v1132_v0 }
 0x46a   :  { %1036 = vmatpush3.bf16.msra.mxu0 %v1188_v4 }
 0x46b   :  { %1037 = vmatprep.subr.bf16.mxu0 %v1132_v0 }
 0x46e   :  { %1038 = vmatpush3.bf16.msra.mxu0 %v1201_v7 }
 0x46f   :  { %1039 = vmatprep.subr.bf16.mxu0 %v1132_v0 }
 0x472   :  { %1040 = vmatpush3.bf16.msra.mxu0 %v1216_v10  ;;  %v521_v10 = vmul.f32 0.8, %v471_v28  ;;  %v651_v28 = vshrl.u32 %v650_v27, 7 }
 0x473   :  { %1041 = vmatprep.subr.bf16.mxu0 %v1132_v0 }
 0x476   :  { %1042 = vmatpush3.bf16.msra.mxu0 %v1227_v11 }
 0x477   :  { %1043 = vmatprep.subr.bf16.mxu0 %v1132_v0 }
 0x47a   :  { %1044 = vmatpush3.bf16.msra.mxu0 %v1239_v13 }
 0x47b   :  { %1045 = vmatprep.subr.bf16.mxu0 %v1132_v0 }
 0x47e   :  { %1046 = vmatpush3.bf16.msra.mxu0 %v1251_v14 }
 0x534   :  { %v507_v1 = vpop.f32.mrb[16].mxu0 }
 0x535   :  { %v513_v2 = vadd.f32 %v507_v1, %v1295_v23  ;;  %v1009_v4 = vpop.f32.mrb[17].mxu0  ;;  %v631_v23 = vld [vmem:[%s1473_s3] sm:$0xff] }
 0x536   :  { %v510_v7 = vpop.f32.mrb[18].mxu0  ;;  %v1087_v38 = vpack.c.bf16 %v632_v36, %v631_v23 }
 0x537   :  { %v517_v31 = vadd.f32 %v516_v21, %v513_v2  ;;  %v1010_v33 = vpop.f32.mrb[19].mxu0  ;;  %v652_v21 = vsub.s32 0, %v651_v28 }
 0x539   :  { %vm518_vm12 = vcmp.gt.f32.partialorder %v517_v31, 0.5  ;;  %v565_v35 = vmul.f32 0.9, %v517_v31  ;;  %v653_v1 = vrot.slane %v648_v30, %v652_v21 }
 0x53a   :  { %v777_v34 = vsel %vm518_vm12, 1.0, %v1132_v0  ;;  %vm778_vm13 = vmpackc.low %vm518_vm12, %vm518_vm12 }
 0x53b   :  { %v522_v11 = vadd.f32 %v777_v34, %v521_v10  ;;  %1028 = vmatmul.mubr.msk.bf16.vlgmr.msra.gmra.mrb[12].mxu1 %vm778_vm13, %v1135_v32  ;;  %v566_v13 = vsub.f32 1.0, %v777_v34 }
 0x53c   :  { %1083 = vmatprep.mubr.msk.f32.mxu1 %vm1133_vm0, %v1132_v0  ;;  %1088 = vmatpush3.bf16.msra.mxu1 %v1087_v38 }
 0x53d   :  { %v567_v14 = vmul.f32 %v566_v13, %v565_v35  ;;  %1089 = vmatprep.subr.bf16.mxu1 %v1134_v15  ;;  %v572_v59 = vmul.f32 0.8, %v522_v11 }
 0x540   :  { %1091 = vmatpush3.bf16.msra.mxu1 %v1090_v40 }
 0x541   :  { %1092 = vmatprep.subr.bf16.mxu1 %v1134_v15 }
 0x544   :  { %1094 = vmatpush3.bf16.msra.mxu1 %v1093_v43 }
 0x545   :  { %1095 = vmatprep.subr.bf16.mxu1 %v1134_v15 }
 0x548   :  { %1097 = vmatpush3.bf16.msra.mxu1 %v1096_v46 }
 0x549   :  { %1098 = vmatprep.subr.bf16.mxu1 %v1134_v15 }
 0x54c   :  { %1100 = vmatpush3.bf16.msra.mxu1 %v1099_v49 }
 0x54d   :  { %1101 = vmatprep.subr.bf16.mxu1 %v1134_v15 }
 0x550   :  { %1103 = vmatpush3.bf16.msra.mxu1 %v1102_v52 }
 0x551   :  { %1104 = vmatprep.subr.bf16.mxu1 %v1134_v15 }
 0x60e   :  { %v558_v53 = vpop.f32.mrb[12].mxu1 }
 0x60f   :  { %v564_v54 = vadd.f32 %v1289_v20, %v558_v53  ;;  %v1029_v55 = vpop.f32.mrb[13].mxu1  ;;  %v644_v20 = vld [vmem:[%s1473_s3 + $0x68] sm:$0xff] }
 0x610   :  { %v561_v56 = vpop.f32.mrb[14].mxu1  ;;  %v1105_v6 = vpack.c.bf16 %v644_v20, %v643_v5 }
 0x611   :  { %v568_v57 = vadd.f32 %v567_v14, %v564_v54  ;;  %v1030_v58 = vpop.f32.mrb[15].mxu1 }
 0x612   :  { %1106 = vmatpush3.bf16.msra.mxu1 %v1105_v6 }
 0x613   :  { %vm569_vm14 = vcmp.gt.f32.partialorder %v568_v57, 0.5  ;;  %v616_v62 = vmul.f32 0.9, %v568_v57  ;;  %1107 = vmatprep.subr.bf16.mxu1 %v1134_v15 }
 0x614   :  { %v780_v60 = vsel %vm569_vm14, 1.0, %v1132_v0  ;;  %vm781_vm15 = vmpackc.low %vm569_vm14, %vm569_vm14 }
 0x615   :  { %v573_v61 = vadd.f32 %v780_v60, %v572_v59  ;;  %1048 = vmatmul.mubr.msk.bf16.vlgmr.msra.gmra.mrb[20].mxu0 %vm781_vm15, %v1135_v32  ;;  %v617_v63 = vsub.f32 1.0, %v780_v60  ;;  %v646_v32 = vld [vmem:[%s1473_s3 + $0x78] sm:$0xff] }
 0x616   :  { %v1108_v9 = vpack.c.bf16 %v646_v32, %v645_v8 }
 0x617   :  { %v618_v3 = vmul.f32 %v617_v63, %v616_v62  ;;  %v623_v25 = vmul.f32 0.8, %v573_v61 }
 0x618   :  { %1109 = vmatpush3.bf16.msra.mxu1 %v1108_v9 }
 0x6e8   :  { %v609_v12 = vpop.f32.mrb[20].mxu0 }
 0x6e9   :  { %v615_v16 = vadd.f32 %v1293_v22, %v609_v12  ;;  %v1049_v17 = vpop.f32.mrb[21].mxu0  ;;  %v727_v22 = vand.u32 127, %v650_v27 }
 0x6ea   :  { %v612_v18 = vpop.f32.mrb[22].mxu0 }
 0x6eb   :  { %v619_v19 = vadd.f32 %v618_v3, %v615_v16  ;;  %v1050_v24 = vpop.f32.mrb[23].mxu0  ;;  %vm728_vm1 = vcmp.lt.s32.totalorder %v727_v22, 4 }
 0x6ed   :  { %vm620_vm0 = vcmp.gt.f32.partialorder %v619_v19, 0.5 }
 0x6ee   :  { %v783_v15 = vsel %vm620_vm0, 1.0, %v1132_v0 }
 0x6ef   :  { %v624_v26 = vadd.f32 %v783_v15, %v623_v25 }
 0x6f1   :  { %1084 = vmatmul.mubr.f32.vlgmr.msra.gmra.mrb[16].mxu1 %v624_v26 }
 0x7c4   :  { %v721_v2 = vpop.f32.mrb[16].mxu1 }
 0x7c5   :  { %v722_v4 = vadd.f32 %v721_v2, %v653_v1  ;;  %v1085_v7 = vpop.f32.mrb[17].mxu1 }
 0x7c7   :  { %v725_v31 = vmul.f32 0.125, %v722_v4 }
 0x7c9   :  { %v729_v33 = vsel %vm728_vm1, %v725_v31, -1e+30 }
 0x7ca   :  { %730 = vmax.xlane.f32.xlu0 %v729_v33 }
 0x857   :  { %v731_v0 = vpop.xlane.xlu0 %730 }
 0x858   :  { %v732_v10 = vsub.f32 %v729_v33, %v731_v0 }
 0x85a   :  { %v733_v34 = vmul.f32 1.442695, %v732_v10 }
 0x85c   :  { %1128 = vpow2.f32 %v733_v34 }
 0x866   :  { %v1129_v11 = vpop.eup %1128 }
 0x867   :  { %735 = vadd.xlane.f32.xlu0 %v1129_v11 }
 0x8f4   :  { %v736_v35 = vpop.xlane.xlu0 %735 }
 0x8f5   :  { %1130 = vrcp.f32 %v736_v35 }
 0x8ff   :  { %v1131_v13 = vpop.eup %1130 }
 0x900   :  { %v738_v14 = vmul.f32 %v1131_v13, %v1129_v11 }
 0x902   :  { %739 = vst [vmem:[%s1475_s5] sm:$0xff] %v738_v14 }

</bundles_post_ra>
